<compile_context>
chip_gen: v7x
topology: tpu7x:2x2x1
jax: 0.10.0
libtpu: 0.0.40
codegen_flags: <defaults>
</compile_context>

<pallas_src>
import jax
import jax.numpy as jnp
from jax.experimental import pallas as pl
from jax.experimental.pallas import tpu as pltpu

LAG = 5                      # self.lag
E = 8                        # nr_experts
B = 256                      # example batch
BT = 128                     # batch rows per grid step

XW = LAG + 3                 # x_aug width: [0, x0..x4, 0, 1]
H_EXP = E * 3 * LAG          # 120 expert pre-activation columns
H_GAT = E * LAG              # 40 gating conv columns
ONE_COL = H_EXP + H_GAT      # 160: constant-1 column (carries post-matmul biases)
HPRE = 256                   # h slab width, padded to 2 full lane groups
NOUT = 2 * E                 # packed output: [expert_preds | softmax]


def mix_kernel(x_ref, wpre_ref, wpost_ref, out_ref):
    # h = relu(x_aug @ Wpre): expert conv+ReLU (cols 0..119), gating 3-tap
    # conv+ReLU (cols 120..159), constant 1 (col 160), zeros (161..255).
    h = jnp.maximum(
        jnp.dot(x_ref[...], wpre_ref[...], preferred_element_type=jnp.float32),
        0.0)                                                        # (BT, 256)

    # One block-diagonal matmul -> [expert_preds | gating logits]; biases are
    # folded in via the constant-1 column (row 160 of Wpost).
    y = jnp.dot(h, wpost_ref[...], preferred_element_type=jnp.float32)  # (BT, 2E)

    # exact, numerically-safe softmax over the gating logits
    logits = y[:, E:]
    m = jnp.max(logits, axis=-1, keepdims=True)
    ex = jnp.exp(logits - m)
    p = ex / jnp.sum(ex, axis=-1, keepdims=True)

    # packed (BT, 2E) output block: expert preds | gating probabilities
    out_ref[:, :E] = y[:, :E]
    out_ref[:, E:] = p


def pack_params(params):
    """One-time folding of all module weights into two constant matmul operands."""
    f32 = jnp.float32
    ew, eb = params["ew"].astype(f32), params["eb"].astype(f32)      # (E,3), (E,3)
    elw, elb = params["elw"].astype(f32), params["elb"].astype(f32)  # (E,15), (E,)
    gcw, gcb = params["gcw"].astype(f32), params["gcb"].astype(f32)  # (E,3), (E,)
    glw, glb = params["glw"].astype(f32), params["glb"].astype(f32)  # (E,40), (E,)

    t = jnp.arange(LAG)
    bias_row = XW - 1                                   # the constant-1 input column

    # ---- Wpre: expert columns (col = (e*3+c)*LAG + t), x[t] lives at x_aug col t+1
    onehot_x = jnp.zeros((XW, LAG), f32).at[t + 1, t].set(1.0)           # (XW, LAG)
    exp_w = onehot_x[:, None, None, :] * ew[None, :, :, None]            # (XW,E,3,LAG)
    exp_b = (jnp.zeros((XW,), f32).at[bias_row].set(1.0)
             [:, None, None, None] * eb[None, :, :, None])               # (XW,E,3,1)
    exp_cols = (exp_w + exp_b).reshape(XW, H_EXP)

    # ---- Wpre: gating conv columns (col = 120 + f*LAG + t), taps x_aug cols t..t+2
    onehot_g = jnp.zeros((XW, 3, LAG), f32)
    for k in range(3):
        onehot_g = onehot_g.at[t + k, k, t].set(1.0)
    gat_w = jnp.einsum("rkt,fk->rft", onehot_g, gcw)                     # (XW,E,LAG)
    gat_b = (jnp.zeros((XW,), f32).at[bias_row].set(1.0)
             [:, None, None] * gcb[None, :, None])                       # (XW,E,1)
    gat_cols = (gat_w + gat_b).reshape(XW, H_GAT)

    one_col = jnp.zeros((XW, 1), f32).at[bias_row, 0].set(1.0)           # relu(1)=1
    wpre = jnp.concatenate(
        [exp_cols, gat_cols, one_col,
         jnp.zeros((XW, HPRE - ONE_COL - 1), f32)], axis=1)              # (8, 256)

    # ---- Wpost: block-diag [expert Linear | gating Linear^T], biases in row 160
    wblk = (jnp.eye(E, dtype=f32)[:, None, :] * elw[:, :, None]).reshape(H_EXP, E)
    wpost = jnp.zeros((HPRE, NOUT), f32)
    wpost = wpost.at[:H_EXP, :E].set(wblk)
    wpost = wpost.at[H_EXP:ONE_COL, E:].set(glw.T)
    wpost = wpost.at[ONE_COL, :E].set(elb)
    wpost = wpost.at[ONE_COL, E:].set(glb)                               # (256, 16)
    return wpre, wpost


@jax.jit
def adaptive_mix_forward(x, wpre, wpost):
    """x: (B, 1, LAG) float32.  Returns (expert_preds (B, E), p_i (B, E))."""
    block_b = BT
    xs = x[:, 0, :].astype(jnp.float32)                      # (B, LAG)
    b0 = xs.shape[0]
    n_blk = max(1, -(-b0 // block_b))
    bp = n_blk * block_b
    if bp != b0:
        xs = jnp.pad(xs, ((0, bp - b0), (0, 0)))

    # the only per-call activation prep: one lane-aligned (Bp, 8) slab
    zeros = jnp.zeros((bp, 1), jnp.float32)
    ones = jnp.ones((bp, 1), jnp.float32)
    x_aug = jnp.concatenate([zeros, xs, zeros, ones], axis=1)  # (Bp, XW)

    out = pl.pallas_call(
        mix_kernel,
        out_shape=jax.ShapeDtypeStruct((bp, NOUT), jnp.float32),
        grid_spec=pltpu.PrefetchScalarGridSpec(
            num_scalar_prefetch=0,
            grid=(n_blk,),
            in_specs=[
                pl.BlockSpec((block_b, XW), lambda i: (i, 0)),   # x_aug
                pl.BlockSpec((XW, HPRE), lambda i: (0, 0)),      # Wpre (constant)
                pl.BlockSpec((HPRE, NOUT), lambda i: (0, 0)),    # Wpost (constant)
            ],
            out_specs=pl.BlockSpec((block_b, NOUT), lambda i: (i, 0)),
        ),
        compiler_params=pltpu.CompilerParams(
            dimension_semantics=("parallel",)),
    )(x_aug, wpre, wpost)

    return out[:b0, :E], out[:b0, E:]


def init_params(key):
    ks = jax.random.split(key, 8)
    s = 0.1
    return {
        # expert Conv1d(1, 3, 1): weight (3,1,1) -> (3,), bias (3,)   stacked over experts
        "ew": s * jax.random.normal(ks[0], (E, 3), jnp.float32),
        "eb": s * jax.random.normal(ks[1], (E, 3), jnp.float32),
        # expert Linear(3*lag, 1): weight (1, 15) -> (15,), bias (1,)
        "elw": s * jax.random.normal(ks[2], (E, 3 * LAG), jnp.float32),
        "elb": s * jax.random.normal(ks[3], (E,), jnp.float32),
        # gating Conv1d(1, E, 3, padding=1): weight (E,1,3) -> (E,3), bias (E,)
        "gcw": s * jax.random.normal(ks[4], (E, 3), jnp.float32),
        "gcb": s * jax.random.normal(ks[5], (E,), jnp.float32),
        # gating Linear(E*lag, E): weight (E, E*lag), bias (E,)
        "glw": s * jax.random.normal(ks[6], (E, E * LAG), jnp.float32),
        "glb": s * jax.random.normal(ks[7], (E,), jnp.float32),
    }


def ref_forward(x, params):
    """Pure-JAX reference mirroring the PyTorch module exactly."""
    xs = x[:, 0, :]
    bsz = xs.shape[0]
    preds = []
    for e in range(E):
        h = jnp.maximum(params["ew"][e][:, None] * xs[:, None, :]
                        + params["eb"][e][:, None], 0.0)          # (B, 3, LAG)
        flat = h.reshape(bsz, 3 * LAG)                            # PyTorch Flatten order
        preds.append(flat @ params["elw"][e] + params["elb"][e])  # (B,)
    preds = jnp.stack(preds, axis=-1)                             # cat(dim=0).permute(1,0)

    xpad = jnp.pad(xs, ((0, 0), (1, 1)))
    conv = jnp.stack([params["gcw"][f, 0] * xpad[:, 0:LAG]
                      + params["gcw"][f, 1] * xpad[:, 1:1 + LAG]
                      + params["gcw"][f, 2] * xpad[:, 2:2 + LAG]
                      + params["gcb"][f] for f in range(E)], axis=1)   # (B, E, LAG)
    g = jnp.maximum(conv, 0.0).reshape(bsz, E * LAG)
    logits = g @ params["glw"].T + params["glb"]
    return preds, jax.nn.softmax(logits, axis=-1)


if __name__ == "__main__":
    key = jax.random.PRNGKey(0)
    kx, kp = jax.random.split(key)
    x = jax.random.normal(kx, (B, 1, LAG), jnp.float32)   # matches PyTorch (B, 1, lag) input
    params = init_params(kp)

    wpre, wpost = pack_params(params)                     # one-time weight folding
    preds, p = adaptive_mix_forward(x, wpre, wpost)
    jax.block_until_ready((preds, p))

    preds_ref, p_ref = ref_forward(x, params)
    assert preds.shape == (B, E) and p.shape == (B, E)
    assert jnp.allclose(preds, preds_ref, rtol=1e-5, atol=1e-5)
    assert jnp.allclose(p, p_ref, rtol=1e-5, atol=1e-5)

    print("KERNEL_OK")
</pallas_src>

<mosaic_0001>
module attributes {stable_mosaic.version = 11 : i64} {
  func.func @mix_kernel(%arg0: i32, %arg1: memref<128x8xf32, #tpu.memory_space<vmem>>, %arg2: memref<8x256xf32, #tpu.memory_space<vmem>>, %arg3: memref<256x16xf32, #tpu.memory_space<vmem>>, %arg4: memref<128x16xf32, #tpu.memory_space<vmem>>) attributes {dimension_semantics = [#tpu.dimension_semantics<parallel>], iteration_bounds = array<i64: 2>, scalar_prefetch = 0 : i64, scratch_operands = 0 : i64, tpu.core_type = #tpu.core_type<tc>, window_params = [{transform_indices = @transform_0, window_bounds = array<i64: 128, 8>}, {pipeline_mode = #tpu.pipeline_mode<synchronous>, transform_indices = @transform_1, window_bounds = array<i64: 8, 256>}, {pipeline_mode = #tpu.pipeline_mode<synchronous>, transform_indices = @transform_2, window_bounds = array<i64: 256, 16>}, {transform_indices = @transform_3, window_bounds = array<i64: 128, 16>}]} {
    %c0 = arith.constant 0 : index
    %c0_0 = arith.constant 0 : index
    %0 = vector.load %arg1[%c0, %c0_0] : memref<128x8xf32, #tpu.memory_space<vmem>>, vector<128x8xf32>
    %c0_1 = arith.constant 0 : index
    %c0_2 = arith.constant 0 : index
    %1 = vector.load %arg2[%c0_1, %c0_2] : memref<8x256xf32, #tpu.memory_space<vmem>>, vector<8x256xf32>
    %cst = arith.constant dense<0.000000e+00> : vector<128x256xf32>
    %2 = tpu.matmul %0, %1, %cst {dimension_numbers = #tpu.dot_dimension_numbers<[1], [0], [0], [1], [0, 0, 1, 1], [], []>} : vector<128x8xf32>, vector<8x256xf32>, vector<128x256xf32> -> vector<128x256xf32>
    %cst_3 = arith.constant 0.000000e+00 : f32
    %3 = vector.broadcast %cst_3 : f32 to vector<128x256xf32>
    %4 = arith.maximumf %2, %3 : vector<128x256xf32>
    %c0_4 = arith.constant 0 : index
    %c0_5 = arith.constant 0 : index
    %5 = vector.load %arg3[%c0_4, %c0_5] : memref<256x16xf32, #tpu.memory_space<vmem>>, vector<256x16xf32>
    %cst_6 = arith.constant dense<0.000000e+00> : vector<128x16xf32>
    %6 = tpu.matmul %4, %5, %cst_6 {dimension_numbers = #tpu.dot_dimension_numbers<[1], [0], [0], [1], [0, 0, 1, 1], [], []>} : vector<128x256xf32>, vector<256x16xf32>, vector<128x16xf32> -> vector<128x16xf32>
    %7 = vector.extract_strided_slice %6 {offsets = [0, 8], sizes = [128, 8], strides = [1, 1]} : vector<128x16xf32> to vector<128x8xf32>
    %cst_7 = arith.constant dense<0xFF800000> : vector<128xf32>
    %8 = vector.multi_reduction <maximumf>, %7, %cst_7 [1] : vector<128x8xf32> to vector<128xf32>
    %9 = vector.shape_cast %8 : vector<128xf32> to vector<128x1xf32>
    %10 = vector.broadcast %9 : vector<128x1xf32> to vector<128x8xf32>
    %11 = arith.subf %7, %10 : vector<128x8xf32>
    %12 = math.exp %11 : vector<128x8xf32>
    %cst_8 = arith.constant dense<0.000000e+00> : vector<128xf32>
    %13 = vector.multi_reduction <add>, %12, %cst_8 [1] : vector<128x8xf32> to vector<128xf32>
    %14 = vector.shape_cast %13 : vector<128xf32> to vector<128x1xf32>
    %15 = vector.broadcast %14 : vector<128x1xf32> to vector<128x8xf32>
    %16 = arith.divf %12, %15 : vector<128x8xf32>
    %17 = vector.extract_strided_slice %6 {offsets = [0, 0], sizes = [128, 8], strides = [1, 1]} : vector<128x16xf32> to vector<128x8xf32>
    %c0_9 = arith.constant 0 : index
    %c0_10 = arith.constant 0 : index
    %18 = vector.load %arg4[%c0_9, %c0_10] : memref<128x16xf32, #tpu.memory_space<vmem>>, vector<128x8xf32>
    tpu.vector_store %arg4[%c0_9, %c0_10], %17 {strides = array<i32>} : memref<128x16xf32, #tpu.memory_space<vmem>>, vector<128x8xf32>,
    %c0_11 = arith.constant 0 : index
    %c8 = arith.constant 8 : index
    %19 = vector.load %arg4[%c0_11, %c8] : memref<128x16xf32, #tpu.memory_space<vmem>>, vector<128x8xf32>
    tpu.vector_store %arg4[%c0_11, %c8], %16 {strides = array<i32>} : memref<128x16xf32, #tpu.memory_space<vmem>>, vector<128x8xf32>,
    return
  }
  func.func @transform_0(%arg0: i32) -> (i32, i32) {
    %c0_i32 = arith.constant 0 : i32
    %c0_i32_0 = arith.constant 0 : i32
    return %arg0, %c0_i32 : i32, i32
  }
  func.func @transform_1(%arg0: i32) -> (i32, i32) {
    %c0_i32 = arith.constant 0 : i32
    %c0_i32_0 = arith.constant 0 : i32
    %c0_i32_1 = arith.constant 0 : i32
    return %c0_i32, %c0_i32_0 : i32, i32
  }
  func.func @transform_2(%arg0: i32) -> (i32, i32) {
    %c0_i32 = arith.constant 0 : i32
    %c0_i32_0 = arith.constant 0 : i32
    %c0_i32_1 = arith.constant 0 : i32
    return %c0_i32, %c0_i32_0 : i32, i32
  }
  func.func @transform_3(%arg0: i32) -> (i32, i32) {
    %c0_i32 = arith.constant 0 : i32
    %c0_i32_0 = arith.constant 0 : i32
    return %arg0, %c0_i32 : i32, i32
  }
}

</mosaic_0001>

<bundles_post_ra>
// kernel: adaptive_mix_forward.1
= control target key start
LH: loop header
LB: loop body
LE: loop exit
PB: predicated region body
PF: predicated region fallthrough
CT: control target
= control target key end

     0   :  { %s1199_s12 = smov 0   ;;  %s1633_s0 = inlined_call_operand.vmem [shape: f32[256,8], index: 0, kind: input, shape index: {}]   ;;  %s1634_s1 = inlined_call_operand.vmem [shape: f32[8,256], index: 1, kind: input, shape index: {}]   ;;  %s1635_s2 = inlined_call_operand.vmem [shape: f32[256,16], index: 2, kind: input, shape index: {}]   ;;  %s1636_s3 = inlined_call_operand.vmem [shape: f32[256,16], index: 3, kind: output, shape index: {}]  }
   0x1 LB: > { %s940_s13 = sadd.s32 4294967295, %s1175_s12   ;;  %p944_p0 = scmp.ge.s32.totalorder %s1175_s12, 1  ;;  %s1175_s12 = sphi %s1199_s12, %s13_s12  }
   0x2   : > { %p138_p1 = scmp.lt.s32.totalorder %s1175_s12, 3 }
   0x4   : > { %p139_p2 = pnand %p944_p0, %p138_p1 }
   0x5   : > { %v191_v0 = vld [vmem:[%s1634_s1 + $0x8] sm:$0xff] (!%p139_p2)  ;;  %v190_v1 = vld [vmem:[%s1634_s1] sm:$0xff] (!%p139_p2)  ;;  %s945_s18 = sshll.u32 (!%p139_p2), %s940_s13, 4  ;;  %v1177_v3 = vmov (!%p139_p2), 0.0   ;;  %v452_v8 = vld [vmem:[%s1635_s2 + $0x90] sm:$0xff] (!%p139_p2)  ;;  %vm192_vm0 = vcmask (!%p139_p2), 64512  }
   0x6   : > { %142 = sbr.rel (%p139_p2) target bundleno = 938 (0x3aa), region = 32  ;;  %v450_v2 = vld [vmem:[%s1635_s2 + $0x80] sm:$0xff] (!%p139_p2)  ;;  %241 = vmatprep.subr.mxu0 (!%p139_p2), %v191_v0  ;;  %305 = vmatprep.mubr.f32.mxu0 (!%p139_p2), %v1177_v3  ;;  %p163_p3 = scmp.lt.s32.totalorder (!%p139_p2), %s945_s18, 31  ;;  %v451_v4 = vld [vmem:[%s1635_s2 + $0x88] sm:$0xff] (!%p139_p2)  ;;  %v453_v9 = vld [vmem:[%s1635_s2 + $0x98] sm:$0xff] (!%p139_p2)  ;;  %vm611_vm1 = vcmask (!%p139_p2), 130112  }
   0x7   : > { %v434_v5 = vld [vmem:[%s1635_s2] sm:$0xff] (!%p139_p2)  ;;  %v435_v6 = vld [vmem:[%s1635_s2 + $0x8] sm:$0xff] (!%p139_p2)  ;;  %242 = vmatpush1.msra.mxu0 (!%p139_p2), %v190_v1  ;;  %v1047_v7 = vpack.c.bf16 (!%p139_p2), %v451_v4, %v450_v2  ;;  %v1051_v11 = vpack.c.bf16 (!%p139_p2), %v453_v9, %v452_v8  ;;  %v436_v12 = vld [vmem:[%s1635_s2 + $0x10] sm:$0xff] (!%p139_p2) }
   0x8   : > { %v1049_v10 = vpack.c.bf16 (!%p139_p2), %v435_v6, %v434_v5  ;;  %v437_v13 = vld [vmem:[%s1635_s2 + $0x18] sm:$0xff] (!%p139_p2)  ;;  %v454_v14 = vld [vmem:[%s1635_s2 + $0xa0] sm:$0xff] (!%p139_p2)  ;;  %v455_v15 = vld [vmem:[%s1635_s2 + $0xa8] sm:$0xff] (!%p139_p2) }
   0x9   : > { %1048 = vmatprep.subr.bf16.mxu0 (!%p139_p2), %v1047_v7  ;;  %1079 = vmatprep.subr.bf16.mxu1 (!%p139_p2), %v1047_v7  ;;  %v1053_v17 = vpack.c.bf16 (!%p139_p2), %v437_v13, %v436_v12  ;;  %v1055_v19 = vpack.c.bf16 (!%p139_p2), %v455_v15, %v454_v14  ;;  %v438_v20 = vld [vmem:[%s1635_s2 + $0x20] sm:$0xff] (!%p139_p2)  ;;  %v439_v21 = vld [vmem:[%s1635_s2 + $0x28] sm:$0xff] (!%p139_p2)  ;;  %v456_v22 = vld [vmem:[%s1635_s2 + $0xb0] sm:$0xff] (!%p139_p2) }
   0xa   : > { %1087 = vmatpush3.bf16.msra.mxu1 (!%p139_p2), %v1049_v10  ;;  %v457_v23 = vld [vmem:[%s1635_s2 + $0xb8] sm:$0xff] (!%p139_p2)  ;;  %v1057_v24 = vpack.c.bf16 (!%p139_p2), %v439_v21, %v438_v20  ;;  %v440_v27 = vld [vmem:[%s1635_s2 + $0x30] sm:$0xff] (!%p139_p2)  ;;  %v458_v29 = vld [vmem:[%s1635_s2 + $0xc0] sm:$0xff] (!%p139_p2) }
   0xb   : > { %1080 = vmatprep.subr.bf16.mxu1 (!%p139_p2), %v1051_v11  ;;  %v1059_v26 = vpack.c.bf16 (!%p139_p2), %v457_v23, %v456_v22  ;;  %v441_v28 = vld [vmem:[%s1635_s2 + $0x38] sm:$0xff] (!%p139_p2)  ;;  %v459_v30 = vld [vmem:[%s1635_s2 + $0xc8] sm:$0xff] (!%p139_p2)  ;;  %v442_v34 = vld [vmem:[%s1635_s2 + $0x40] sm:$0xff] (!%p139_p2) }
   0xc   : > { %v1061_v31 = vpack.c.bf16 (!%p139_p2), %v441_v28, %v440_v27  ;;  %v1063_v33 = vpack.c.bf16 (!%p139_p2), %v459_v30, %v458_v29  ;;  %v443_v35 = vld [vmem:[%s1635_s2 + $0x48] sm:$0xff] (!%p139_p2)  ;;  %v460_v36 = vld [vmem:[%s1635_s2 + $0xd0] sm:$0xff] (!%p139_p2)  ;;  %v461_v37 = vld [vmem:[%s1635_s2 + $0xd8] sm:$0xff] (!%p139_p2) }
   0xd   : > { %s1638_s18 = smov (!%p163_p3, %s945_s18), 31  ;;  %v1065_v38 = vpack.c.bf16 %v443_v35, %v442_v34  ;;  %v1067_v40 = vpack.c.bf16 %v461_v37, %v460_v36  ;;  %v444_v41 = vld [vmem:[%s1635_s2 + $0x50] sm:$0xff]  ;;  %v445_v42 = vld [vmem:[%s1635_s2 + $0x58] sm:$0xff]  ;;  %v462_v43 = vld [vmem:[%s1635_s2 + $0xe0] sm:$0xff] }
   0xe   : > { %s946_s4 = sshll.u32 %s1638_s18, 3  ;;  %1088 = vmatpush3.bf16.msra.mxu1 %v1053_v17  ;;  %v463_v44 = vld [vmem:[%s1635_s2 + $0xe8] sm:$0xff]  ;;  %v1069_v45 = vpack.c.bf16 %v445_v42, %v444_v41  ;;  %v446_v48 = vld [vmem:[%s1635_s2 + $0x60] sm:$0xff]  ;;  %v464_v61 = vld [vmem:[%s1635_s2 + $0xf0] sm:$0xff]  ;;  %s1178_s18 = smov 120  }
   0xf   : > { %s1246_s11 = scalar_lea.vmem %s1633_s0, %s946_s4  ;;  %1081 = vmatprep.subr.bf16.mxu1 %v1055_v19  ;;  %v1071_v47 = vpack.c.bf16 %v463_v44, %v462_v43  ;;  %v447_v49 = vld [vmem:[%s1635_s2 + $0x68] sm:$0xff]  ;;  %v465_v62 = vld [vmem:[%s1635_s2 + $0xf8] sm:$0xff]  ;;  %v448_v0 = vld [vmem:[%s1635_s2 + $0x70] sm:$0xff]  ;;  %s1372_s16 = scalar_lea.vmem %s1636_s3, %s946_s4 }
  0x10   : > { %v174_v16 = vld [vmem:[%s1246_s11] sm:$0xff]  ;;  %v175_v18 = vld [vmem:[%s1246_s11 + $0x8] sm:$0xff]  ;;  %v176_v25 = vld [vmem:[%s1246_s11 + $0x10] sm:$0xff]  ;;  %v1073_v50 = vpack.c.bf16 %v447_v49, %v446_v48  ;;  %v1075_v63 = vpack.c.bf16 %v465_v62, %v464_v61 }
  0x11   : > { %949 = vmatmul.mubr.msk.f32.vlgmr.msra.gmra.mrb[0].mxu0 %vm192_vm0, %v174_v16  ;;  %v177_v32 = vld [vmem:[%s1246_s11 + $0x18] sm:$0xff]  ;;  %v178_v39 = vld [vmem:[%s1246_s11 + $0x20] sm:$0xff]  ;;  %v179_v46 = vld [vmem:[%s1246_s11 + $0x28] sm:$0xff] }
  0x12   : > { %311 = vmatprep.mubr.f32.mxu0 %v1177_v3  ;;  %1050 = vmatpush3.bf16.msra.mxu0 %v1049_v10  ;;  %v180_v51 = vld [vmem:[%s1246_s11 + $0x30] sm:$0xff]  ;;  %v181_v52 = vld [vmem:[%s1246_s11 + $0x38] sm:$0xff]  ;;  %v182_v53 = vld [vmem:[%s1246_s11 + $0x40] sm:$0xff] }
  0x13   : > { %1052 = vmatprep.subr.bf16.mxu0 %v1051_v11  ;;  %1089 = vmatpush3.bf16.msra.mxu1 %v1057_v24  ;;  %v183_v54 = vld [vmem:[%s1246_s11 + $0x48] sm:$0xff]  ;;  %v184_v55 = vld [vmem:[%s1246_s11 + $0x50] sm:$0xff]  ;;  %v185_v56 = vld [vmem:[%s1246_s11 + $0x58] sm:$0xff] }
  0x14   : > { %1082 = vmatprep.subr.bf16.mxu1 %v1059_v26  ;;  %v186_v57 = vld [vmem:[%s1246_s11 + $0x60] sm:$0xff]  ;;  %v187_v58 = vld [vmem:[%s1246_s11 + $0x68] sm:$0xff]  ;;  %v188_v59 = vld [vmem:[%s1246_s11 + $0x70] sm:$0xff] }
  0x15   : > { %950 = vmatmul.mubr.msk.f32.gmra.mrb[2].mxu0 %vm192_vm0, %v175_v18  ;;  %v189_v60 = vld [vmem:[%s1246_s11 + $0x78] sm:$0xff] }
  0x16   : > { %317 = vmatprep.mubr.f32.mxu0 %v1177_v3  ;;  %1054 = vmatpush3.bf16.msra.mxu0 %v1053_v17  ;;  %v449_v1 = vld [vmem:[%s1635_s2 + $0x78] sm:$0xff] }
  0x17   : > { %1056 = vmatprep.subr.bf16.mxu0 %v1055_v19  ;;  %1090 = vmatpush3.bf16.msra.mxu1 %v1061_v31  ;;  %v1077_v2 = vpack.c.bf16 %v449_v1, %v448_v0 }
  0x18   : > { %1083 = vmatprep.subr.bf16.mxu1 %v1063_v33 }
  0x19   : > { %951 = vmatmul.mubr.msk.f32.gmra.mrb[4].mxu0 %vm192_vm0, %v176_v25 }
  0x1a   : > { %323 = vmatprep.mubr.f32.mxu0 %v1177_v3  ;;  %1058 = vmatpush3.bf16.msra.mxu0 %v1057_v24 }
  0x1b   : > { %1060 = vmatprep.subr.bf16.mxu0 %v1059_v26  ;;  %1091 = vmatpush3.bf16.msra.mxu1 %v1065_v38 }
  0x1c   : > { %1084 = vmatprep.subr.bf16.mxu1 %v1067_v40 }
  0x1d   : > { %952 = vmatmul.mubr.msk.f32.gmra.mrb[6].mxu0 %vm192_vm0, %v177_v32 }
  0x1e   : > { %329 = vmatprep.mubr.f32.mxu0 %v1177_v3  ;;  %1062 = vmatpush3.bf16.msra.mxu0 %v1061_v31 }
  0x1f   : > { %1064 = vmatprep.subr.bf16.mxu0 %v1063_v33  ;;  %1092 = vmatpush3.bf16.msra.mxu1 %v1069_v45 }
  0x20   : > { %1085 = vmatprep.subr.bf16.mxu1 %v1071_v47 }
  0x21   : > { %953 = vmatmul.mubr.msk.f32.gmra.mrb[8].mxu0 %vm192_vm0, %v178_v39 }
  0x22   : > { %335 = vmatprep.mubr.f32.mxu0 %v1177_v3  ;;  %1066 = vmatpush3.bf16.msra.mxu0 %v1065_v38 }
  0x23   : > { %1068 = vmatprep.subr.bf16.mxu0 %v1067_v40  ;;  %1093 = vmatpush3.bf16.msra.mxu1 %v1073_v50 }
  0x24   : > { %1086 = vmatprep.subr.bf16.mxu1 %v1075_v63 }
  0x25   : > { %954 = vmatmul.mubr.msk.f32.gmra.mrb[10].mxu0 %vm192_vm0, %v179_v46 }
  0x26   : > { %341 = vmatprep.mubr.f32.mxu0 %v1177_v3  ;;  %1070 = vmatpush3.bf16.msra.mxu0 %v1069_v45 }
  0x27   : > { %1072 = vmatprep.subr.bf16.mxu0 %v1071_v47  ;;  %1094 = vmatpush3.bf16.msra.mxu1 %v1077_v2 }
  0x29   : > { %955 = vmatmul.mubr.msk.f32.gmra.mrb[12].mxu0 %vm192_vm0, %v180_v51 }
  0x2a   : > { %347 = vmatprep.mubr.f32.mxu0 %v1177_v3  ;;  %1074 = vmatpush3.bf16.msra.mxu0 %v1073_v50 }
  0x2b   : > { %1076 = vmatprep.subr.bf16.mxu0 %v1075_v63 }
  0x2d   : > { %956 = vmatmul.mubr.msk.f32.gmra.mrb[14].mxu0 %vm192_vm0, %v181_v52 }
  0x2e   : > { %353 = vmatprep.mubr.f32.mxu0 %v1177_v3  ;;  %1078 = vmatpush3.bf16.msra.mxu0 %v1077_v2 }
  0x31   : > { %957 = vmatmul.mubr.msk.f32.gmra.mrb[16].mxu0 %vm192_vm0, %v182_v53 }
  0x32   : > { %359 = vmatprep.mubr.f32.mxu0 %v1177_v3 }
  0x35   : > { %958 = vmatmul.mubr.msk.f32.gmra.mrb[18].mxu0 %vm192_vm0, %v183_v54 }
  0x36   : > { %365 = vmatprep.mubr.f32.mxu0 %v1177_v3 }
  0x39   : > { %959 = vmatmul.mubr.msk.f32.gmra.mrb[20].mxu0 %vm192_vm0, %v184_v55 }
  0x3a   : > { %371 = vmatprep.mubr.f32.mxu0 %v1177_v3 }
  0x3d   : > { %960 = vmatmul.mubr.msk.f32.gmra.mrb[22].mxu0 %vm192_vm0, %v185_v56 }
  0x3e   : > { %377 = vmatprep.mubr.f32.mxu0 %v1177_v3 }
  0x41   : > { %961 = vmatmul.mubr.msk.f32.gmra.mrb[24].mxu0 %vm192_vm0, %v186_v57 }
  0x42   : > { %383 = vmatprep.mubr.f32.mxu0 %v1177_v3 }
  0x45   : > { %962 = vmatmul.mubr.msk.f32.gmra.mrb[26].mxu0 %vm192_vm0, %v187_v58 }
  0x46   : > { %389 = vmatprep.mubr.f32.mxu0 %v1177_v3 }
  0x49   : > { %963 = vmatmul.mubr.msk.f32.gmra.mrb[28].mxu0 %vm192_vm0, %v188_v59 }
  0x4a   : > { %395 = vmatprep.mubr.f32.mxu0 %v1177_v3 }
  0x4d   : > { %964 = vmatmul.mubr.msk.f32.gmra.mrb[30].mxu0 %vm192_vm0, %v189_v60 }
  0xe4   : > { %v307_v3 = vpop.f32.mrb[0].mxu0 }
  0xe5   : > { %v309_v4 = vpop.f32.mrb[1].mxu0  ;;  %v402_v6 = vmax.f32 %v307_v3, 0.0 }
  0xe6   : > { %v403_v5 = vmax.f32 %v309_v4, 0.0 }
  0xe8   : > { %v313_v7 = vpop.f32.mrb[2].mxu0  ;;  %530 = vmatprep.mubr.f32.mxu0 %v403_v5 }
  0xe9   : > { %v315_v8 = vpop.f32.mrb[3].mxu0  ;;  %531 = vmatmul.mubr.f32.vlgmr.msra.gmra.mrb[32].mxu0 %v402_v6  ;;  %v404_v10 = vmax.f32 %v313_v7, 0.0 }
  0xea   : > { %v405_v9 = vmax.f32 %v315_v8, 0.0 }
  0xec   : > { %v319_v11 = vpop.f32.mrb[4].mxu0  ;;  %535 = vmatprep.mubr.f32.mxu0 %v405_v9 }
  0xed   : > { %v321_v12 = vpop.f32.mrb[5].mxu0  ;;  %536 = vmatmul.mubr.f32.gmra.mrb[34].mxu0 %v404_v10  ;;  %v406_v14 = vmax.f32 %v319_v11, 0.0 }
  0xee   : > { %v407_v13 = vmax.f32 %v321_v12, 0.0 }
  0xf0   : > { %v325_v15 = vpop.f32.mrb[6].mxu0  ;;  %540 = vmatprep.mubr.f32.mxu0 %v407_v13 }
  0xf1   : > { %v327_v16 = vpop.f32.mrb[7].mxu0  ;;  %541 = vmatmul.mubr.f32.gmra.mrb[36].mxu0 %v406_v14  ;;  %v408_v18 = vmax.f32 %v325_v15, 0.0 }
  0xf2   : > { %v409_v17 = vmax.f32 %v327_v16, 0.0 }
  0xf4   : > { %v331_v19 = vpop.f32.mrb[8].mxu0  ;;  %545 = vmatprep.mubr.f32.mxu1 %v409_v17 }
  0xf5   : > { %v333_v20 = vpop.f32.mrb[9].mxu0  ;;  %546 = vmatmul.mubr.f32.vlgmr.msra.gmra.mrb[0].mxu1 %v408_v18  ;;  %v410_v22 = vmax.f32 %v331_v19, 0.0 }
  0xf6   : > { %v411_v21 = vmax.f32 %v333_v20, 0.0 }
  0xf8   : > { %v337_v23 = vpop.f32.mrb[10].mxu0  ;;  %550 = vmatprep.mubr.f32.mxu1 %v411_v21 }
  0xf9   : > { %v339_v24 = vpop.f32.mrb[11].mxu0  ;;  %551 = vmatmul.mubr.f32.gmra.mrb[2].mxu1 %v410_v22  ;;  %v412_v26 = vmax.f32 %v337_v23, 0.0 }
  0xfa   : > { %v413_v25 = vmax.f32 %v339_v24, 0.0 }
  0xfc   : > { %v343_v27 = vpop.f32.mrb[12].mxu0  ;;  %555 = vmatprep.mubr.f32.mxu1 %v413_v25 }
  0xfd   : > { %v345_v28 = vpop.f32.mrb[13].mxu0  ;;  %556 = vmatmul.mubr.f32.gmra.mrb[4].mxu1 %v412_v26  ;;  %v414_v30 = vmax.f32 %v343_v27, 0.0 }
  0xfe   : > { %v415_v29 = vmax.f32 %v345_v28, 0.0 }
 0x100   : > { %v349_v31 = vpop.f32.mrb[14].mxu0  ;;  %560 = vmatprep.mubr.f32.mxu1 %v415_v29 }
 0x101   : > { %v351_v32 = vpop.f32.mrb[15].mxu0  ;;  %561 = vmatmul.mubr.f32.gmra.mrb[6].mxu1 %v414_v30  ;;  %v416_v34 = vmax.f32 %v349_v31, 0.0 }
 0x102   : > { %v417_v33 = vmax.f32 %v351_v32, 0.0 }
 0x104   : > { %v355_v35 = vpop.f32.mrb[16].mxu0  ;;  %565 = vmatprep.mubr.f32.mxu1 %v417_v33 }
 0x105   : > { %v357_v36 = vpop.f32.mrb[17].mxu0  ;;  %566 = vmatmul.mubr.f32.gmra.mrb[8].mxu1 %v416_v34  ;;  %v418_v38 = vmax.f32 %v355_v35, 0.0 }
 0x106   : > { %v419_v37 = vmax.f32 %v357_v36, 0.0 }
 0x108   : > { %v361_v39 = vpop.f32.mrb[18].mxu0  ;;  %570 = vmatprep.mubr.f32.mxu1 %v419_v37 }
 0x109   : > { %v363_v40 = vpop.f32.mrb[19].mxu0  ;;  %571 = vmatmul.mubr.f32.gmra.mrb[10].mxu1 %v418_v38  ;;  %v420_v42 = vmax.f32 %v361_v39, 0.0 }
 0x10a   : > { %v421_v41 = vmax.f32 %v363_v40, 0.0 }
 0x10c   : > { %v367_v43 = vpop.f32.mrb[20].mxu0  ;;  %575 = vmatprep.mubr.f32.mxu1 %v421_v41 }
 0x10d   : > { %v369_v44 = vpop.f32.mrb[21].mxu0  ;;  %576 = vmatmul.mubr.f32.gmra.mrb[12].mxu1 %v420_v42  ;;  %v422_v46 = vmax.f32 %v367_v43, 0.0 }
 0x10e   : > { %v423_v45 = vmax.f32 %v369_v44, 0.0 }
 0x110   : > { %v373_v47 = vpop.f32.mrb[22].mxu0  ;;  %580 = vmatprep.mubr.f32.mxu1 %v423_v45 }
 0x111   : > { %v375_v48 = vpop.f32.mrb[23].mxu0  ;;  %581 = vmatmul.mubr.f32.gmra.mrb[14].mxu1 %v422_v46  ;;  %v424_v50 = vmax.f32 %v373_v47, 0.0 }
 0x112   : > { %v425_v49 = vmax.f32 %v375_v48, 0.0 }
 0x114   : > { %v379_v51 = vpop.f32.mrb[24].mxu0  ;;  %585 = vmatprep.mubr.f32.mxu1 %v425_v49 }
 0x115   : > { %v381_v52 = vpop.f32.mrb[25].mxu0  ;;  %586 = vmatmul.mubr.f32.gmra.mrb[16].mxu1 %v424_v50  ;;  %v426_v54 = vmax.f32 %v379_v51, 0.0 }
 0x116   : > { %v427_v53 = vmax.f32 %v381_v52, 0.0 }
 0x118   : > { %v385_v55 = vpop.f32.mrb[26].mxu0  ;;  %590 = vmatprep.mubr.f32.mxu1 %v427_v53 }
 0x119   : > { %v387_v56 = vpop.f32.mrb[27].mxu0  ;;  %591 = vmatmul.mubr.f32.gmra.mrb[18].mxu1 %v426_v54  ;;  %v428_v58 = vmax.f32 %v385_v55, 0.0 }
 0x11a   : > { %v429_v57 = vmax.f32 %v387_v56, 0.0 }
 0x11c   : > { %v391_v59 = vpop.f32.mrb[28].mxu0  ;;  %595 = vmatprep.mubr.f32.mxu1 %v429_v57 }
 0x11d   : > { %v393_v60 = vpop.f32.mrb[29].mxu0  ;;  %596 = vmatmul.mubr.f32.gmra.mrb[20].mxu1 %v428_v58  ;;  %v430_v62 = vmax.f32 %v391_v59, 0.0 }
 0x11e   : > { %v431_v61 = vmax.f32 %v393_v60, 0.0 }
 0x120   : > { %v397_v63 = vpop.f32.mrb[30].mxu0  ;;  %600 = vmatprep.mubr.f32.mxu1 %v431_v61 }
 0x121   : > { %v399_v0 = vpop.f32.mrb[31].mxu0  ;;  %601 = vmatmul.mubr.f32.gmra.mrb[22].mxu1 %v430_v62  ;;  %v432_v2 = vmax.f32 %v397_v63, 0.0 }
 0x122   : > { %v433_v1 = vmax.f32 %v399_v0, 0.0 }
 0x124   : > { %605 = vmatprep.mubr.f32.mxu1 %v433_v1 }
 0x125   : > { %606 = vmatmul.mubr.f32.gmra.mrb[24].mxu1 %v432_v2 }
 0x1bc   : > { %v999_v3 = vpop.f32.mrb[32].mxu0 }
 0x1bd   : > { %v1000_v4 = vpop.f32.mrb[33].mxu0 }
 0x1be   : > { %v1374_v5 = vadd.f32 %v1000_v4, %v999_v3 }
 0x1c0   : > { %852 = vst.msk [vmem:[%s1372_s16] sm:$0xff] %vm192_vm0, %v1374_v5  ;;  %v1002_v6 = vpop.f32.mrb[34].mxu0  ;;  %v612_v7 = vsel %vm611_vm1, %v1374_v5, -inf }
 0x1c1   : > { %v1003_v8 = vpop.f32.mrb[35].mxu0  ;;  %613 = vmax.xlane.f32.xlu0 %v612_v7 }
 0x1c2   : > { %v1381_v9 = vadd.f32 %v1003_v8, %v1002_v6 }
 0x1c4   : > { %853 = vst.msk [vmem:[%s1372_s16 + $0x8] sm:$0xff] %vm192_vm0, %v1381_v9  ;;  %v1005_v10 = vpop.f32.mrb[36].mxu0  ;;  %v615_v11 = vsel %vm611_vm1, %v1381_v9, -inf }
 0x1c5   : > { %v1006_v12 = vpop.f32.mrb[37].mxu0  ;;  %616 = vmax.xlane.f32.xlu0 %v615_v11 }
 0x1c6   : > { %v1388_v13 = vadd.f32 %v1006_v12, %v1005_v10 }
 0x1c8   : > { %854 = vst.msk [vmem:[%s1372_s16 + $0x10] sm:$0xff] %vm192_vm0, %v1388_v13  ;;  %v1008_v14 = vpop.f32.mrb[0].mxu1  ;;  %v618_v15 = vsel %vm611_vm1, %v1388_v13, -inf }
 0x1c9   : > { %v1009_v16 = vpop.f32.mrb[1].mxu1  ;;  %619 = vmax.xlane.f32.xlu1 %v618_v15 }
 0x1ca   : > { %v1395_v17 = vadd.f32 %v1009_v16, %v1008_v14 }
 0x1cc   : > { %855 = vst.msk [vmem:[%s1372_s16 + $0x18] sm:$0xff] %vm192_vm0, %v1395_v17  ;;  %v1011_v18 = vpop.f32.mrb[2].mxu1  ;;  %v621_v19 = vsel %vm611_vm1, %v1395_v17, -inf }
 0x1cd   : > { %v1012_v20 = vpop.f32.mrb[3].mxu1  ;;  %622 = vmax.xlane.f32.xlu1 %v621_v19 }
 0x1ce   : > { %v1402_v21 = vadd.f32 %v1012_v20, %v1011_v18 }
 0x1d0   : > { %856 = vst.msk [vmem:[%s1372_s16 + $0x20] sm:$0xff] %vm192_vm0, %v1402_v21  ;;  %v1014_v22 = vpop.f32.mrb[4].mxu1  ;;  %v624_v23 = vsel %vm611_vm1, %v1402_v21, -inf }
 0x1d1   : > { %v1015_v24 = vpop.f32.mrb[5].mxu1  ;;  %625 = vmax.xlane.f32.xlu0 %v624_v23 }
 0x1d2   : > { %v1409_v25 = vadd.f32 %v1015_v24, %v1014_v22 }
 0x1d4   : > { %857 = vst.msk [vmem:[%s1372_s16 + $0x28] sm:$0xff] %vm192_vm0, %v1409_v25  ;;  %v1017_v26 = vpop.f32.mrb[6].mxu1  ;;  %v627_v27 = vsel %vm611_vm1, %v1409_v25, -inf }
 0x1d5   : > { %v1018_v28 = vpop.f32.mrb[7].mxu1  ;;  %628 = vmax.xlane.f32.xlu1 %v627_v27 }
 0x1d6   : > { %v1416_v29 = vadd.f32 %v1018_v28, %v1017_v26 }
 0x1d8   : > { %858 = vst.msk [vmem:[%s1372_s16 + $0x30] sm:$0xff] %vm192_vm0, %v1416_v29  ;;  %v1020_v30 = vpop.f32.mrb[8].mxu1  ;;  %v630_v31 = vsel %vm611_vm1, %v1416_v29, -inf }
 0x1d9   : > { %v1021_v32 = vpop.f32.mrb[9].mxu1  ;;  %631 = vmax.xlane.f32.xlu0 %v630_v31 }
 0x1da   : > { %v1423_v33 = vadd.f32 %v1021_v32, %v1020_v30 }
 0x1dc   : > { %859 = vst.msk [vmem:[%s1372_s16 + $0x38] sm:$0xff] %vm192_vm0, %v1423_v33  ;;  %v1023_v34 = vpop.f32.mrb[10].mxu1  ;;  %v633_v35 = vsel %vm611_vm1, %v1423_v33, -inf }
 0x1dd   : > { %v1024_v36 = vpop.f32.mrb[11].mxu1  ;;  %634 = vmax.xlane.f32.xlu1 %v633_v35 }
 0x1de   : > { %v1430_v37 = vadd.f32 %v1024_v36, %v1023_v34 }
 0x1e0   : > { %860 = vst.msk [vmem:[%s1372_s16 + $0x40] sm:$0xff] %vm192_vm0, %v1430_v37  ;;  %v1026_v38 = vpop.f32.mrb[12].mxu1  ;;  %v636_v39 = vsel %vm611_vm1, %v1430_v37, -inf }
 0x1e1   : > { %v1027_v40 = vpop.f32.mrb[13].mxu1  ;;  %637 = vmax.xlane.f32.xlu0 %v636_v39 }
 0x1e2   : > { %v1437_v41 = vadd.f32 %v1027_v40, %v1026_v38 }
 0x1e4   : > { %861 = vst.msk [vmem:[%s1372_s16 + $0x48] sm:$0xff] %vm192_vm0, %v1437_v41  ;;  %v1029_v42 = vpop.f32.mrb[14].mxu1  ;;  %v639_v43 = vsel %vm611_vm1, %v1437_v41, -inf }
 0x1e5   : > { %v1030_v44 = vpop.f32.mrb[15].mxu1  ;;  %640 = vmax.xlane.f32.xlu1 %v639_v43 }
 0x1e6   : > { %v1444_v45 = vadd.f32 %v1030_v44, %v1029_v42 }
 0x1e8   : > { %862 = vst.msk [vmem:[%s1372_s16 + $0x50] sm:$0xff] %vm192_vm0, %v1444_v45  ;;  %v1032_v46 = vpop.f32.mrb[16].mxu1  ;;  %v642_v47 = vsel %vm611_vm1, %v1444_v45, -inf }
 0x1e9   : > { %v1033_v48 = vpop.f32.mrb[17].mxu1  ;;  %643 = vmax.xlane.f32.xlu0 %v642_v47 }
 0x1ea   : > { %v1451_v49 = vadd.f32 %v1033_v48, %v1032_v46 }
 0x1ec   : > { %863 = vst.msk [vmem:[%s1372_s16 + $0x58] sm:$0xff] %vm192_vm0, %v1451_v49  ;;  %v1035_v50 = vpop.f32.mrb[18].mxu1  ;;  %v645_v51 = vsel %vm611_vm1, %v1451_v49, -inf }
 0x1ed   : > { %v1036_v52 = vpop.f32.mrb[19].mxu1  ;;  %646 = vmax.xlane.f32.xlu1 %v645_v51 }
 0x1ee   : > { %v1458_v53 = vadd.f32 %v1036_v52, %v1035_v50 }
 0x1f0   : > { %864 = vst.msk [vmem:[%s1372_s16 + $0x60] sm:$0xff] %vm192_vm0, %v1458_v53  ;;  %v1038_v54 = vpop.f32.mrb[20].mxu1  ;;  %v648_v55 = vsel %vm611_vm1, %v1458_v53, -inf }
 0x1f1   : > { %v1039_v56 = vpop.f32.mrb[21].mxu1  ;;  %649 = vmax.xlane.f32.xlu0 %v648_v55 }
 0x1f2   : > { %v1465_v57 = vadd.f32 %v1039_v56, %v1038_v54 }
 0x1f4   : > { %865 = vst.msk [vmem:[%s1372_s16 + $0x68] sm:$0xff] %vm192_vm0, %v1465_v57  ;;  %v1041_v58 = vpop.f32.mrb[22].mxu1  ;;  %v651_v59 = vsel %vm611_vm1, %v1465_v57, -inf }
 0x1f5   : > { %v1042_v60 = vpop.f32.mrb[23].mxu1  ;;  %652 = vmax.xlane.f32.xlu1 %v651_v59 }
 0x1f6   : > { %v1472_v61 = vadd.f32 %v1042_v60, %v1041_v58 }
 0x1f8   : > { %866 = vst.msk [vmem:[%s1372_s16 + $0x70] sm:$0xff] %vm192_vm0, %v1472_v61  ;;  %v1044_v62 = vpop.f32.mrb[24].mxu1  ;;  %v654_v63 = vsel %vm611_vm1, %v1472_v61, -inf }
 0x1f9   : > { %655 = vmax.xlane.f32.xlu0 %v654_v63  ;;  %v1045_v0 = vpop.f32.mrb[25].mxu1 }
 0x1fa   : > { %v1479_v1 = vadd.f32 %v1045_v0, %v1044_v62 }
 0x1fc   : > { %867 = vst.msk [vmem:[%s1372_s16 + $0x78] sm:$0xff] %vm192_vm0, %v1479_v1  ;;  %v657_v2 = vsel %vm611_vm1, %v1479_v1, -inf }
 0x1fd   : > { %658 = vmax.xlane.f32.xlu1 %v657_v2 }
 0x24e   : > { %v614_v3 = vpop.xlane.xlu0 %613 }
 0x24f   : > { %v660_v4 = vsub.f32 %v1374_v5, %v614_v3 }
 0x251   : > { %v676_v6 = vmul.f32 1.442695, %v660_v4 }
 0x252   : > { %v617_v7 = vpop.xlane.xlu0 %616 }
 0x253   : > { %1105 = vpow2.f32 %v676_v6  ;;  %v661_v8 = vsub.f32 %v1381_v9, %v617_v7 }
 0x255   : > { %v678_v10 = vmul.f32 1.442695, %v661_v8 }
 0x256   : > { %v620_v11 = vpop.xlane.xlu1 %619 }
 0x257   : > { %1107 = vpow2.f32 %v678_v10  ;;  %v662_v12 = vsub.f32 %v1388_v13, %v620_v11 }
 0x259   : > { %v680_v14 = vmul.f32 1.442695, %v662_v12 }
 0x25a   : > { %v623_v15 = vpop.xlane.xlu1 %622 }
 0x25b   : > { %1109 = vpow2.f32 %v680_v14  ;;  %v663_v16 = vsub.f32 %v1395_v17, %v623_v15 }
 0x25d   : > { %v1490_v18 = vpop.eup %1105  ;;  %v682_v19 = vmul.f32 1.442695, %v663_v16 }
 0x25e   : > { %724 = vrot.lane.b32.xlu0 %v1490_v18, %s1178_s18  ;;  %v626_v5 = vpop.xlane.xlu0 %625 }
 0x25f   : > { %1111 = vpow2.f32 %v682_v19  ;;  %v664_v9 = vsub.f32 %v1402_v21, %v626_v5 }
 0x261   : > { %v1495_v20 = vpop.eup %1107  ;;  %v684_v22 = vmul.f32 1.442695, %v664_v9 }
 0x262   : > { %v629_v13 = vpop.xlane.xlu1 %628  ;;  %726 = vrot.lane.b32.xlu1 %v1495_v20, %s1178_s18 }
 0x263   : > { %1113 = vpow2.f32 %v684_v22  ;;  %v665_v17 = vsub.f32 %v1409_v25, %v629_v13 }
 0x265   : > { %v1500_v23 = vpop.eup %1109  ;;  %v686_v24 = vmul.f32 1.442695, %v665_v17 }
 0x266   : > { %v632_v26 = vpop.xlane.xlu0 %631  ;;  %728 = vrot.lane.b32.xlu1 %v1500_v23, %s1178_s18 }
 0x267   : > { %1115 = vpow2.f32 %v686_v24  ;;  %v666_v21 = vsub.f32 %v1416_v29, %v632_v26 }
 0x269   : > { %v1505_v27 = vpop.eup %1111  ;;  %v688_v28 = vmul.f32 1.442695, %v666_v21 }
 0x26a   : > { %v635_v30 = vpop.xlane.xlu1 %634  ;;  %730 = vrot.lane.b32.xlu1 %v1505_v27, %s1178_s18 }
 0x26b   : > { %1117 = vpow2.f32 %v688_v28  ;;  %v667_v25 = vsub.f32 %v1423_v33, %v635_v30 }
 0x26d   : > { %v1510_v31 = vpop.eup %1113  ;;  %v690_v32 = vmul.f32 1.442695, %v667_v25 }
 0x26e   : > { %732 = vrot.lane.b32.xlu0 %v1510_v31, %s1178_s18  ;;  %v638_v34 = vpop.xlane.xlu0 %637 }
 0x26f   : > { %1119 = vpow2.f32 %v690_v32  ;;  %v668_v29 = vsub.f32 %v1430_v37, %v638_v34 }
 0x271   : > { %v1515_v35 = vpop.eup %1115  ;;  %v692_v36 = vmul.f32 1.442695, %v668_v29 }
 0x272   : > { %v641_v38 = vpop.xlane.xlu1 %640  ;;  %734 = vrot.lane.b32.xlu1 %v1515_v35, %s1178_s18 }
 0x273   : > { %1121 = vpow2.f32 %v692_v36  ;;  %v669_v33 = vsub.f32 %v1437_v41, %v641_v38 }
 0x275   : > { %v1520_v39 = vpop.eup %1117  ;;  %v694_v40 = vmul.f32 1.442695, %v669_v33 }
 0x276   : > { %736 = vrot.lane.b32.xlu0 %v1520_v39, %s1178_s18  ;;  %v644_v42 = vpop.xlane.xlu0 %643 }
 0x277   : > { %1123 = vpow2.f32 %v694_v40  ;;  %v670_v37 = vsub.f32 %v1444_v45, %v644_v42 }
 0x279   : > { %v1525_v43 = vpop.eup %1119  ;;  %v696_v44 = vmul.f32 1.442695, %v670_v37 }
 0x27a   : > { %v647_v46 = vpop.xlane.xlu1 %646  ;;  %738 = vrot.lane.b32.xlu1 %v1525_v43, %s1178_s18 }
 0x27b   : > { %1125 = vpow2.f32 %v696_v44  ;;  %v671_v41 = vsub.f32 %v1451_v49, %v647_v46 }
 0x27d   : > { %v1530_v47 = vpop.eup %1121  ;;  %v698_v48 = vmul.f32 1.442695, %v671_v41 }
 0x27e   : > { %740 = vrot.lane.b32.xlu0 %v1530_v47, %s1178_s18  ;;  %v650_v50 = vpop.xlane.xlu0 %649 }
 0x27f   : > { %1127 = vpow2.f32 %v698_v48  ;;  %v672_v45 = vsub.f32 %v1458_v53, %v650_v50 }
 0x281   : > { %v1535_v51 = vpop.eup %1123  ;;  %v700_v52 = vmul.f32 1.442695, %v672_v45 }
 0x282   : > { %v653_v54 = vpop.xlane.xlu1 %652  ;;  %742 = vrot.lane.b32.xlu1 %v1535_v51, %s1178_s18 }
 0x283   : > { %1129 = vpow2.f32 %v700_v52  ;;  %v673_v49 = vsub.f32 %v1465_v57, %v653_v54 }
 0x285   : > { %v1540_v55 = vpop.eup %1125  ;;  %v702_v56 = vmul.f32 1.442695, %v673_v49 }
 0x286   : > { %744 = vrot.lane.b32.xlu0 %v1540_v55, %s1178_s18  ;;  %v656_v58 = vpop.xlane.xlu0 %655 }
 0x287   : > { %1131 = vpow2.f32 %v702_v56  ;;  %v674_v53 = vsub.f32 %v1472_v61, %v656_v58 }
 0x289   : > { %v1545_v59 = vpop.eup %1127  ;;  %v704_v60 = vmul.f32 1.442695, %v674_v53 }
 0x28a   : > { %746 = vrot.lane.b32.xlu1 %v1545_v59, %s1178_s18  ;;  %v659_v62 = vpop.xlane.xlu1 %658 }
 0x28b   : > { %1133 = vpow2.f32 %v704_v60  ;;  %v675_v57 = vsub.f32 %v1479_v1, %v659_v62 }
 0x28d   : > { %v1550_v63 = vpop.eup %1129  ;;  %v706_v0 = vmul.f32 1.442695, %v675_v57 }
 0x28e   : > { %748 = vrot.lane.b32.xlu0 %v1550_v63, %s1178_s18 }
 0x28f   : > { %1135 = vpow2.f32 %v706_v0 }
 0x291   : > { %v1554_v2 = vpop.eup %1131 }
 0x292   : > { %750 = vrot.lane.b32.xlu1 %v1554_v2, %s1178_s18 }
 0x295   : > { %v1558_v61 = vpop.eup %1133 }
 0x296   : > { %752 = vrot.lane.b32.xlu0 %v1558_v61, %s1178_s18 }
 0x299   : > { %v1562_v3 = vpop.eup %1135 }
 0x29a   : > { %754 = vrot.lane.b32.xlu1 %v1562_v3, %s1178_s18 }
 0x2d0   : > { %v725_v1 = vpop.permute.xlu0 %724 }
 0x2d1   : > { %v772_v4 = vsel %vm192_vm0, %v725_v1, 0.0 }
 0x2d2   : > { %773 = vadd.xlane.f32.xlu0 %v772_v4 }
 0x2d4   : > { %v727_v6 = vpop.permute.xlu1 %726 }
 0x2d5   : > { %v775_v7 = vsel %vm192_vm0, %v727_v6, 0.0 }
 0x2d6   : > { %776 = vadd.xlane.f32.xlu1 %v775_v7 }
 0x2d8   : > { %v729_v8 = vpop.permute.xlu1 %728 }
 0x2d9   : > { %v778_v10 = vsel %vm192_vm0, %v729_v8, 0.0 }
 0x2da   : > { %779 = vadd.xlane.f32.xlu0 %v778_v10 }
 0x2dc   : > { %v731_v11 = vpop.permute.xlu1 %730 }
 0x2dd   : > { %v781_v12 = vsel %vm192_vm0, %v731_v11, 0.0 }
 0x2de   : > { %782 = vadd.xlane.f32.xlu0 %v781_v12 }
 0x2e0   : > { %v733_v14 = vpop.permute.xlu0 %732 }
 0x2e1   : > { %v784_v15 = vsel %vm192_vm0, %v733_v14, 0.0 }
 0x2e2   : > { %785 = vadd.xlane.f32.xlu0 %v784_v15 }
 0x2e4   : > { %v735_v16 = vpop.permute.xlu1 %734 }
 0x2e5   : > { %v787_v19 = vsel %vm192_vm0, %v735_v16, 0.0 }
 0x2e6   : > { %788 = vadd.xlane.f32.xlu1 %v787_v19 }
 0x2e8   : > { %v737_v5 = vpop.permute.xlu0 %736 }
 0x2e9   : > { %v790_v9 = vsel %vm192_vm0, %v737_v5, 0.0 }
 0x2ea   : > { %791 = vadd.xlane.f32.xlu0 %v790_v9 }
 0x2ec   : > { %v739_v22 = vpop.permute.xlu1 %738 }
 0x2ed   : > { %v793_v13 = vsel %vm192_vm0, %v739_v22, 0.0 }
 0x2ee   : > { %794 = vadd.xlane.f32.xlu1 %v793_v13 }
 0x2f0   : > { %v741_v17 = vpop.permute.xlu0 %740 }
 0x2f1   : > { %v796_v24 = vsel %vm192_vm0, %v741_v17, 0.0 }
 0x2f2   : > { %797 = vadd.xlane.f32.xlu0 %v796_v24 }
 0x2f4   : > { %v743_v26 = vpop.permute.xlu1 %742 }
 0x2f5   : > { %v799_v21 = vsel %vm192_vm0, %v743_v26, 0.0 }
 0x2f6   : > { %800 = vadd.xlane.f32.xlu1 %v799_v21 }
 0x2f8   : > { %v745_v28 = vpop.permute.xlu0 %744 }
 0x2f9   : > { %v802_v30 = vsel %vm192_vm0, %v745_v28, 0.0 }
 0x2fa   : > { %803 = vadd.xlane.f32.xlu0 %v802_v30 }
 0x2fc   : > { %v747_v25 = vpop.permute.xlu1 %746 }
 0x2fd   : > { %v805_v32 = vsel %vm192_vm0, %v747_v25, 0.0 }
 0x2fe   : > { %806 = vadd.xlane.f32.xlu1 %v805_v32 }
 0x300   : > { %v749_v34 = vpop.permute.xlu0 %748 }
 0x301   : > { %v808_v29 = vsel %vm192_vm0, %v749_v34, 0.0 }
 0x302   : > { %809 = vadd.xlane.f32.xlu0 %v808_v29 }
 0x304   : > { %v751_v36 = vpop.permute.xlu1 %750 }
 0x305   : > { %v811_v38 = vsel %vm192_vm0, %v751_v36, 0.0 }
 0x306   : > { %812 = vadd.xlane.f32.xlu1 %v811_v38 }
 0x308   : > { %v753_v33 = vpop.permute.xlu0 %752 }
 0x309   : > { %v814_v40 = vsel %vm192_vm0, %v753_v33, 0.0 }
 0x30a   : > { %815 = vadd.xlane.f32.xlu0 %v814_v40 }
 0x30c   : > { %v755_v42 = vpop.permute.xlu1 %754 }
 0x30d   : > { %v817_v37 = vsel %vm192_vm0, %v755_v42, 0.0 }
 0x30e   : > { %818 = vadd.xlane.f32.xlu1 %v817_v37 }
 0x35f   : > { %v774_v44 = vpop.xlane.xlu0 %773 }
 0x360   : > { %1137 = vrcp.f32 %v774_v44 }
 0x363   : > { %v777_v46 = vpop.xlane.xlu1 %776 }
 0x364   : > { %1139 = vrcp.f32 %v777_v46 }
 0x367   : > { %v780_v41 = vpop.xlane.xlu0 %779 }
 0x368   : > { %1141 = vrcp.f32 %v780_v41 }
 0x36a   : > { %v1138_v48 = vpop.eup %1137 }
 0x36b   : > { %v821_v50 = vmul.f32 %v1138_v48, %v1490_v18  ;;  %v783_v45 = vpop.xlane.xlu0 %782 }
 0x36c   : > { %1143 = vrcp.f32 %v783_v45 }
 0x36d   : > { %868 = vst.msk [vmem:[%s1372_s16] sm:$0xff] %vm611_vm1, %v821_v50 }
 0x36e   : > { %v1140_v52 = vpop.eup %1139 }
 0x36f   : > { %v823_v54 = vmul.f32 %v1140_v52, %v1495_v20  ;;  %v786_v49 = vpop.xlane.xlu0 %785 }
 0x370   : > { %1145 = vrcp.f32 %v786_v49 }
 0x371   : > { %869 = vst.msk [vmem:[%s1372_s16 + $0x8] sm:$0xff] %vm611_vm1, %v823_v54 }
 0x372   : > { %v1142_v56 = vpop.eup %1141 }
 0x373   : > { %v825_v58 = vmul.f32 %v1142_v56, %v1500_v23  ;;  %v789_v53 = vpop.xlane.xlu1 %788 }
 0x374   : > { %1147 = vrcp.f32 %v789_v53 }
 0x375   : > { %870 = vst.msk [vmem:[%s1372_s16 + $0x10] sm:$0xff] %vm611_vm1, %v825_v58 }
 0x376   : > { %v1144_v18 = vpop.eup %1143 }
 0x377   : > { %v827_v60 = vmul.f32 %v1144_v18, %v1505_v27  ;;  %v792_v62 = vpop.xlane.xlu0 %791 }
 0x378   : > { %1149 = vrcp.f32 %v792_v62 }
 0x379   : > { %871 = vst.msk [vmem:[%s1372_s16 + $0x18] sm:$0xff] %vm611_vm1, %v827_v60 }
 0x37a   : > { %v1146_v20 = vpop.eup %1145 }
 0x37b   : > { %v829_v57 = vmul.f32 %v1146_v20, %v1510_v31  ;;  %v795_v0 = vpop.xlane.xlu1 %794 }
 0x37c   : > { %1151 = vrcp.f32 %v795_v0 }
 0x37d   : > { %872 = vst.msk [vmem:[%s1372_s16 + $0x20] sm:$0xff] %vm611_vm1, %v829_v57 }
 0x37e   : > { %v1148_v23 = vpop.eup %1147 }
 0x37f   : > { %v831_v1 = vmul.f32 %v1148_v23, %v1515_v35  ;;  %v798_v4 = vpop.xlane.xlu0 %797 }
 0x380   : > { %1153 = vrcp.f32 %v798_v4 }
 0x381   : > { %873 = vst.msk [vmem:[%s1372_s16 + $0x28] sm:$0xff] %vm611_vm1, %v831_v1 }
 0x382   : > { %v1150_v27 = vpop.eup %1149 }
 0x383   : > { %v833_v6 = vmul.f32 %v1150_v27, %v1520_v39  ;;  %v801_v7 = vpop.xlane.xlu1 %800 }
 0x384   : > { %1155 = vrcp.f32 %v801_v7 }
 0x385   : > { %874 = vst.msk [vmem:[%s1372_s16 + $0x30] sm:$0xff] %vm611_vm1, %v833_v6 }
 0x386   : > { %v1152_v31 = vpop.eup %1151 }
 0x387   : > { %v835_v8 = vmul.f32 %v1152_v31, %v1525_v43  ;;  %v804_v10 = vpop.xlane.xlu0 %803 }
 0x388   : > { %1157 = vrcp.f32 %v804_v10 }
 0x389   : > { %875 = vst.msk [vmem:[%s1372_s16 + $0x38] sm:$0xff] %vm611_vm1, %v835_v8 }
 0x38a   : > { %v1154_v35 = vpop.eup %1153 }
 0x38b   : > { %v837_v11 = vmul.f32 %v1154_v35, %v1530_v47  ;;  %v807_v12 = vpop.xlane.xlu1 %806 }
 0x38c   : > { %1159 = vrcp.f32 %v807_v12 }
 0x38d   : > { %876 = vst.msk [vmem:[%s1372_s16 + $0x40] sm:$0xff] %vm611_vm1, %v837_v11 }
 0x38e   : > { %v1156_v39 = vpop.eup %1155 }
 0x38f   : > { %v839_v14 = vmul.f32 %v1156_v39, %v1535_v51  ;;  %v810_v15 = vpop.xlane.xlu0 %809 }
 0x390   : > { %1161 = vrcp.f32 %v810_v15 }
 0x391   : > { %877 = vst.msk [vmem:[%s1372_s16 + $0x48] sm:$0xff] %vm611_vm1, %v839_v14 }
 0x392   : > { %v1158_v43 = vpop.eup %1157 }
 0x393   : > { %v841_v16 = vmul.f32 %v1158_v43, %v1540_v55  ;;  %v813_v19 = vpop.xlane.xlu1 %812 }
 0x394   : > { %1163 = vrcp.f32 %v813_v19 }
 0x395   : > { %878 = vst.msk [vmem:[%s1372_s16 + $0x50] sm:$0xff] %vm611_vm1, %v841_v16 }
 0x396   : > { %v1160_v47 = vpop.eup %1159 }
 0x397   : > { %v843_v5 = vmul.f32 %v1160_v47, %v1545_v59  ;;  %v816_v9 = vpop.xlane.xlu0 %815 }
 0x398   : > { %1165 = vrcp.f32 %v816_v9 }
 0x399   : > { %879 = vst.msk [vmem:[%s1372_s16 + $0x58] sm:$0xff] %vm611_vm1, %v843_v5 }
 0x39a   : > { %v1162_v51 = vpop.eup %1161 }
 0x39b   : > { %v845_v22 = vmul.f32 %v1162_v51, %v1550_v63  ;;  %v819_v13 = vpop.xlane.xlu1 %818 }
 0x39c   : > { %1167 = vrcp.f32 %v819_v13 }
 0x39d   : > { %880 = vst.msk [vmem:[%s1372_s16 + $0x60] sm:$0xff] %vm611_vm1, %v845_v22 }
 0x39e   : > { %v1164_v55 = vpop.eup %1163 }
 0x39f   : > { %v847_v17 = vmul.f32 %v1164_v55, %v1554_v2 }
 0x3a1   : > { %881 = vst.msk [vmem:[%s1372_s16 + $0x68] sm:$0xff] %vm611_vm1, %v847_v17 }
 0x3a2   : > { %v1166_v24 = vpop.eup %1165 }
 0x3a3   : > { %v849_v59 = vmul.f32 %v1166_v24, %v1558_v61 }
 0x3a5   : > { %882 = vst.msk [vmem:[%s1372_s16 + $0x70] sm:$0xff] %vm611_vm1, %v849_v59 }
 0x3a6   : > { %v1168_v26 = vpop.eup %1167 }
 0x3a7   : > { %v851_v21 = vmul.f32 %v1168_v26, %v1562_v3 }
 0x3a9   : > { %883 = vst.msk [vmem:[%s1372_s16 + $0x78] sm:$0xff] %vm611_vm1, %v851_v21 }
 0x3aa PF: > { %s13_s12 = sadd.s32 1, %s1175_s12  }
 0x3ab   : > { %p10_p4 = scmp.ge.s32.totalorder %s13_s12, 4  }
 0x3ad   :  { %12 = sbr.rel (!%p10_p4) target bundleno = 1 (0x1), region = 62 }

</bundles_post_ra>
